<compile_context>
chip_gen: v6e
topology: v6e:2x2x1
jax: 0.10.0
libtpu: 0.0.40
codegen_flags: <defaults>
</compile_context>

<pallas_src>
import jax
import jax.numpy as jnp
from jax.experimental import pallas as pl
from jax.experimental.pallas import tpu as pltpu


def jam_kernel(y_ref, w1_ref, w3_ref, o_ref):
    bt, L, W = y_ref.shape
    n = bt * L

    # (Bt, L, W) -> (Bt*L, W); leading-dim collapse (free when L % 8 == 0).
    y = y_ref[...].astype(jnp.float32).reshape(n, W)

    # Row index within each folded batch element (0..L-1).  Masking rows
    # l == 0 / l == L-1 applies the conv's zero padding and simultaneously
    # zeroes any rows that rolled across a batch boundary.
    l_idx = jax.lax.broadcasted_iota(jnp.int32, (n, 1), 0) % L

    y_prev = jnp.where(l_idx == 0, 0.0, pltpu.roll(y, shift=1, axis=0))
    y_next = jnp.where(l_idx == L - 1, 0.0, pltpu.roll(y, shift=n - 1, axis=0))

    # eam_conv3x3 (Conv1d(in_w, in_w, 3, padding=1)): single fused MXU matmul
    # over all three taps, K = 3W.
    ycat = jnp.concatenate([y_prev, y, y_next], axis=-1)          # (Bt*L, 3W)
    z = jnp.dot(ycat, w3_ref[...], preferred_element_type=jnp.float32)

    # eam_conv1x1 (Conv1d(in_w, 1, 1)) + sigmoid: VPU multiply + XLU lane
    # reduction + EUP sigmoid (an N=1 MXU matmul would waste 127/128 lanes).
    s = jax.nn.sigmoid(jnp.sum(y * w1_ref[...], axis=-1, keepdims=True))

    # F.leaky_relu default negative_slope = 0.01
    lrelu = jnp.where(z > 0, z, 0.01 * z)

    # F_ecm = sigmoid(conv1x1) * leaky_relu(conv3x3); ECM_out = F_ecm^T + Y
    ecm = s * lrelu + y

    # TODO(synk): the CLAM(in_c) submodule is not defined in the reference
    # file; the ECM output is returned without applying self.clam.
    o_ref[...] = ecm.reshape(bt, L, W).astype(o_ref.dtype)


def _pick_block_batch(B, L, target_rows=512):
    """Largest divisor of B giving ~target_rows rows per block, while keeping
    >= 2 grid iterations when B > 1 (so v7x's two TensorCores share work)."""
    bt = max(1, min(B, target_rows // max(L, 1)))
    if B > 1:
        bt = min(bt, max(1, B // 2))
    while B % bt != 0:
        bt -= 1
    return bt


def jam_forward(y, w1, w3, *, block_batch=None):
    """y: (B, in_c, in_w); w1: (in_w,) = eam_conv1x1.weight.reshape(-1);
    w3: (in_w, in_w, 3) = eam_conv3x3.weight (out_ch, in_ch, kernel)."""
    B, L, W = y.shape
    bt = block_batch if block_batch is not None else _pick_block_batch(B, L)
    assert B % bt == 0, "block_batch must divide the batch size"

    w1_row = w1.reshape(1, W).astype(jnp.float32)                  # (1, in_w)
    # (co, ci, k) -> (k, ci, co) -> (3W, W); row k*W + ci matches the lane
    # order of the in-kernel concat [y_prev | y | y_next].
    w3_cat = jnp.transpose(w3, (2, 1, 0)).reshape(3 * W, W).astype(jnp.float32)

    itemsize = jnp.dtype(y.dtype).itemsize
    block_bytes = bt * L * W * itemsize
    weight_bytes = (3 * W * W + W) * 4
    # in + out blocks double-buffered + weights + f32 intermediates, with
    # headroom; well under v7x's 64 MiB physical VMEM.
    vmem_limit = int(min(48 * 1024 * 1024,
                         max(4 * 1024 * 1024,
                             8 * block_bytes + 4 * weight_bytes)))

    cost = pl.CostEstimate(
        flops=2 * B * L * W * (3 * W + 1) + 6 * B * L * W,
        transcendentals=B * L,
        bytes_accessed=2 * B * L * W * itemsize + weight_bytes,
    )

    return pl.pallas_call(
        jam_kernel,
        out_shape=jax.ShapeDtypeStruct((B, L, W), y.dtype),
        grid_spec=pltpu.PrefetchScalarGridSpec(
            num_scalar_prefetch=0,
            grid=(B // bt,),
            in_specs=[
                pl.BlockSpec((bt, L, W), lambda b: (b, 0, 0)),
                pl.BlockSpec((1, W), lambda b: (0, 0)),
                pl.BlockSpec((3 * W, W), lambda b: (0, 0)),
            ],
            out_specs=pl.BlockSpec((bt, L, W), lambda b: (b, 0, 0)),
        ),
        compiler_params=pltpu.CompilerParams(
            dimension_semantics=("parallel",),
            vmem_limit_bytes=vmem_limit,
        ),
        cost_estimate=cost,
    )(y, w1_row, w3_cat)


def jam_ref(y, w1, w3):
    """Pure-JAX reference mirroring the PyTorch forward (minus CLAM)."""
    B, L, W = y.shape
    yt = jnp.transpose(y, (0, 2, 1))                                  # (B, W, L)
    f1 = jax.nn.sigmoid(jnp.einsum('c,bcl->bl', w1, yt))[:, None, :]  # (B, 1, L)
    ytp = jnp.pad(yt, ((0, 0), (0, 0), (1, 1)))
    f2 = jnp.zeros((B, W, L), jnp.float32)
    for k in range(3):
        f2 = f2 + jnp.einsum('oc,bcl->bol', w3[:, :, k], ytp[:, :, k:k + L])
    f2 = jnp.where(f2 > 0, f2, 0.01 * f2)
    fecm = f1 * f2
    return jnp.transpose(fecm, (0, 2, 1)) + y


if __name__ == "__main__":
    B, in_c, in_w = 8, 8, 16                     # Y: (B, in_c, in_w)
    key = jax.random.PRNGKey(0)
    k_y, k_w1, k_w3 = jax.random.split(key, 3)

    y = jax.random.normal(k_y, (B, in_c, in_w), dtype=jnp.float32)
    # Weight shapes from nn.Conv1d (both bias=False in the spec):
    #   eam_conv1x1.weight: (1, in_w, 1)     -> flattened to (in_w,)
    #   eam_conv3x3.weight: (in_w, in_w, 3)
    w1 = 0.1 * jax.random.normal(k_w1, (in_w,), dtype=jnp.float32)
    w3 = 0.1 * jax.random.normal(k_w3, (in_w, in_w, 3), dtype=jnp.float32)

    out = jam_forward(y, w1, w3)
    out = jax.block_until_ready(out)

    ref = jam_ref(y, w1, w3)
    assert out.shape == (B, in_c, in_w)
    assert jnp.allclose(out, ref, atol=5e-5, rtol=5e-5), "mismatch vs reference"

    print("KERNEL_OK")
</pallas_src>

<mosaic_0001>
module attributes {stable_mosaic.version = 11 : i64} {
  func.func @jam_kernel(%arg0: i32, %arg1: memref<4x8x16xf32, #tpu.memory_space<vmem>>, %arg2: memref<1x16xf32, #tpu.memory_space<vmem>>, %arg3: memref<48x16xf32, #tpu.memory_space<vmem>>, %arg4: memref<4x8x16xf32, #tpu.memory_space<vmem>>) attributes {dimension_semantics = [#tpu.dimension_semantics<parallel>], iteration_bounds = array<i64: 2>, scalar_prefetch = 0 : i64, scratch_operands = 0 : i64, tpu.core_type = #tpu.core_type<tc>, window_params = [{transform_indices = @transform_0, window_bounds = array<i64: 4, 8, 16>}, {pipeline_mode = #tpu.pipeline_mode<synchronous>, transform_indices = @transform_1, window_bounds = array<i64: 1, 16>}, {pipeline_mode = #tpu.pipeline_mode<synchronous>, transform_indices = @transform_2, window_bounds = array<i64: 48, 16>}, {transform_indices = @transform_3, window_bounds = array<i64: 4, 8, 16>}]} {
    %c0 = arith.constant 0 : index
    %c0_0 = arith.constant 0 : index
    %c0_1 = arith.constant 0 : index
    %0 = vector.load %arg1[%c0, %c0_0, %c0_1] : memref<4x8x16xf32, #tpu.memory_space<vmem>>, vector<4x8x16xf32>
    %1 = vector.shape_cast %0 : vector<4x8x16xf32> to vector<32x16xf32>
    %2 = tpu.iota {dimensions = array<i32: 0>} : vector<32x1xi32>
    %c8_i32 = arith.constant 8 : i32
    %c0_i32 = arith.constant 0 : i32
    %3 = arith.cmpi eq, %c8_i32, %c0_i32 : i32
    %c1_i32 = arith.constant 1 : i32
    %4 = arith.select %3, %c1_i32, %c8_i32 : i32
    %5 = vector.broadcast %4 : i32 to vector<32x1xi32>
    %6 = arith.remsi %2, %5 : vector<32x1xi32>
    %c0_i32_2 = arith.constant 0 : i32
    %7 = vector.broadcast %c0_i32_2 : i32 to vector<32x1xi32>
    %8 = arith.cmpi ne, %6, %7 : vector<32x1xi32>
    %c0_i32_3 = arith.constant 0 : i32
    %9 = vector.broadcast %c0_i32_3 : i32 to vector<32x1xi32>
    %10 = arith.cmpi slt, %6, %9 : vector<32x1xi32>
    %c0_i32_4 = arith.constant 0 : i32
    %11 = arith.cmpi slt, %4, %c0_i32_4 : i32
    %12 = vector.broadcast %11 : i1 to vector<32x1xi1>
    %13 = vector.broadcast %12 : vector<32x1xi1> to vector<32x1xi1>
    %14 = arith.xori %10, %13 : vector<32x1xi1>
    %15 = arith.andi %14, %8 : vector<32x1xi1>
    %16 = vector.broadcast %4 : i32 to vector<32x1xi32>
    %17 = arith.addi %6, %16 : vector<32x1xi32>
    %18 = arith.select %15, %17, %6 : vector<32x1xi1>, vector<32x1xi32>
    %c0_i32_5 = arith.constant 0 : i32
    %19 = vector.broadcast %c0_i32_5 : i32 to vector<32x1xi32>
    %20 = arith.cmpi eq, %18, %19 : vector<32x1xi32>
    %c1_i32_6 = arith.constant 1 : i32
    %21 = tpu.dynamic_rotate %1 by %c1_i32_6 dim 0 : vector<32x16xf32>, i32 -> vector<32x16xf32>
    %cst = arith.constant 0.000000e+00 : f32
    %22 = vector.shape_cast %20 : vector<32x1xi1> to vector<32x1xi1>
    %23 = vector.broadcast %22 : vector<32x1xi1> to vector<32x16xi1>
    %24 = vector.broadcast %cst : f32 to vector<32x16xf32>
    %25 = arith.select %23, %24, %21 : vector<32x16xi1>, vector<32x16xf32>
    %c7_i32 = arith.constant 7 : i32
    %26 = vector.broadcast %c7_i32 : i32 to vector<32x1xi32>
    %27 = arith.cmpi eq, %18, %26 : vector<32x1xi32>
    %c31_i32 = arith.constant 31 : i32
    %28 = tpu.dynamic_rotate %1 by %c31_i32 dim 0 : vector<32x16xf32>, i32 -> vector<32x16xf32>
    %cst_7 = arith.constant 0.000000e+00 : f32
    %29 = vector.shape_cast %27 : vector<32x1xi1> to vector<32x1xi1>
    %30 = vector.broadcast %29 : vector<32x1xi1> to vector<32x16xi1>
    %31 = vector.broadcast %cst_7 : f32 to vector<32x16xf32>
    %32 = arith.select %30, %31, %28 : vector<32x16xi1>, vector<32x16xf32>
    %33 = tpu.concatenate %25, %1, %32 in 1 : vector<32x16xf32>, vector<32x16xf32>, vector<32x16xf32> -> vector<32x48xf32>
    %c0_8 = arith.constant 0 : index
    %c0_9 = arith.constant 0 : index
    %34 = vector.load %arg3[%c0_8, %c0_9] : memref<48x16xf32, #tpu.memory_space<vmem>>, vector<48x16xf32>
    %cst_10 = arith.constant dense<0.000000e+00> : vector<32x16xf32>
    %35 = tpu.matmul %33, %34, %cst_10 {dimension_numbers = #tpu.dot_dimension_numbers<[1], [0], [0], [1], [0, 0, 1, 1], [], []>} : vector<32x48xf32>, vector<48x16xf32>, vector<32x16xf32> -> vector<32x16xf32>
    %c0_11 = arith.constant 0 : index
    %c0_12 = arith.constant 0 : index
    %36 = vector.load %arg2[%c0_11, %c0_12] : memref<1x16xf32, #tpu.memory_space<vmem>>, vector<1x16xf32>
    %37 = vector.broadcast %36 : vector<1x16xf32> to vector<32x16xf32>
    %38 = arith.mulf %1, %37 : vector<32x16xf32>
    %cst_13 = arith.constant dense<0.000000e+00> : vector<32xf32>
    %39 = vector.multi_reduction <add>, %38, %cst_13 [1] : vector<32x16xf32> to vector<32xf32>
    %40 = vector.shape_cast %39 : vector<32xf32> to vector<32x1xf32>
    %41 = arith.negf %40 : vector<32x1xf32>
    %42 = math.exp %41 : vector<32x1xf32>
    %cst_14 = arith.constant 1.000000e+00 : f32
    %43 = vector.broadcast %cst_14 : f32 to vector<32x1xf32>
    %44 = arith.addf %43, %42 : vector<32x1xf32>
    %45 = arith.divf %43, %44 : vector<32x1xf32>
    %cst_15 = arith.constant 0.000000e+00 : f32
    %46 = vector.broadcast %cst_15 : f32 to vector<32x16xf32>
    %47 = arith.cmpf ogt, %35, %46 : vector<32x16xf32>
    %cst_16 = arith.constant 0.00999999977 : f32
    %48 = vector.broadcast %cst_16 : f32 to vector<32x16xf32>
    %49 = arith.mulf %48, %35 : vector<32x16xf32>
    %50 = arith.select %47, %35, %49 : vector<32x16xi1>, vector<32x16xf32>
    %51 = vector.broadcast %45 : vector<32x1xf32> to vector<32x16xf32>
    %52 = arith.mulf %51, %50 : vector<32x16xf32>
    %53 = arith.addf %52, %1 : vector<32x16xf32>
    %54 = vector.shape_cast %53 : vector<32x16xf32> to vector<4x8x16xf32>
    %c0_17 = arith.constant 0 : index
    %c0_18 = arith.constant 0 : index
    %c0_19 = arith.constant 0 : index
    %55 = vector.load %arg4[%c0_17, %c0_18, %c0_19] : memref<4x8x16xf32, #tpu.memory_space<vmem>>, vector<4x8x16xf32>
    tpu.vector_store %arg4[%c0_17, %c0_18, %c0_19], %54 {strides = array<i32>} : memref<4x8x16xf32, #tpu.memory_space<vmem>>, vector<4x8x16xf32>,
    return
  }
  func.func @transform_0(%arg0: i32) -> (i32, i32, i32) {
    %c0_i32 = arith.constant 0 : i32
    %c0_i32_0 = arith.constant 0 : i32
    %c0_i32_1 = arith.constant 0 : i32
    return %arg0, %c0_i32, %c0_i32_0 : i32, i32, i32
  }
  func.func @transform_1(%arg0: i32) -> (i32, i32) {
    %c0_i32 = arith.constant 0 : i32
    %c0_i32_0 = arith.constant 0 : i32
    %c0_i32_1 = arith.constant 0 : i32
    return %c0_i32, %c0_i32_0 : i32, i32
  }
  func.func @transform_2(%arg0: i32) -> (i32, i32) {
    %c0_i32 = arith.constant 0 : i32
    %c0_i32_0 = arith.constant 0 : i32
    %c0_i32_1 = arith.constant 0 : i32
    return %c0_i32, %c0_i32_0 : i32, i32
  }
  func.func @transform_3(%arg0: i32) -> (i32, i32, i32) {
    %c0_i32 = arith.constant 0 : i32
    %c0_i32_0 = arith.constant 0 : i32
    %c0_i32_1 = arith.constant 0 : i32
    return %arg0, %c0_i32, %c0_i32_0 : i32, i32, i32
  }
}

</mosaic_0001>

<bundles_post_ra>
// kernel: tpu_custom_call.1
= control target key start
LH: loop header
LB: loop body
LE: loop exit
PB: predicated region body
PF: predicated region fallthrough
CT: control target
= control target key end

     0   :  { %8 = vsyncpa [#allocation3], 0  ;;  %s1022_s0 = inlined_call_operand.vmem [shape: f32[8,8,16], index: 0, kind: input, shape index: {}]   ;;  %s1023_s1 = inlined_call_operand.vmem [shape: f32[1,16], index: 1, kind: input, shape index: {}]   ;;  %s1024_s2 = inlined_call_operand.vmem [shape: f32[48,16], index: 2, kind: input, shape index: {}]   ;;  %s1025_s3 = inlined_call_operand.hbm [shape: f32[8,8,16], index: 3, kind: output, shape index: {}]  }
   0x1   :  { %10 = vsyncpa [#allocation3 + $0x1], 0  ;;  %s780_s12 = smov 0   ;;  %s782_s13 = smov 0  }
   0x2   :  { %s784_s14 = smov 0   ;;  %s786_s15 = smov 0  }
   0x3 LB: > { %s801_s16 = sadd.s32 4294967295, %s753_s15   ;;  %s572_s17 = sadd.s32 4294967294, %s753_s15   ;;  %s753_s15 = sphi %s786_s15, %s1047_s15   ;;  %s749_s14 = sphi %s784_s14, %s1046_s14   ;;  %s745_s13 = sphi %s782_s13, %s1045_s13   ;;  %s741_s12 = sphi %s780_s12, %s1044_s12  }
   0x4   : > { %s805_s18 = sadd.s32 1, %s753_s15   ;;  %s91_s19 = sadd.s32 1, %s749_s14 }
   0x5   : > { %s88_s20 = ssub.s32 %s753_s15, %s805_s18  ;;  %p101_p0 = scmp.ne.s32.totalorder %s749_s14, %s745_s13 }
   0x6   : > { %p89_p1 = scmp.eq.s32.totalorder %s88_s20, 0  ;;  %p102_p2 = scmp.eq.s32.totalorder %s801_s16, 1 }
   0x7   : > { %p107_p3 = scmp.ne.s32.totalorder %s745_s13, %s741_s12  ;;  %p108_p4 = scmp.eq.s32.totalorder %s572_s17, 1 }
   0x8   : > { %s816_s21 = scalar_select %p89_p1, %s749_s14, %s91_s19  }
   0x9   : > { %p818_p5 = por %p102_p2, %p101_p0  ;;  %p822_p6 = por %p108_p4, %p107_p3 }
   0xa   : > { %p575_p7 = scmp.ge.s32.totalorder %s753_s15, 1  ;;  %p141_p8 = scmp.lt.s32.totalorder %s753_s15, 3 }
   0xc   : > { %p142_p9 = pnand %p575_p7, %p141_p8 }
   0xd   : > { %s577_s24 = sshll.u32 (!%p142_p9), %s801_s16, 2  ;;  %s755_s17 = smov (!%p142_p9), 16  }
   0xe   : > { %145 = sbr.rel (%p142_p9) target bundleno = 372 (0x174), region = 32  ;;  %p166_p10 = scmp.lt.s32.totalorder (!%p142_p9), %s577_s24, 7 }
   0xf   : > { %s162_s27 = sand.u32 (!%p142_p9), 1, %s745_s13   ;;  %s593_s29 = sshll.u32 (!%p142_p9), %s801_s16, 9 }
  0x10   : > { %s576_s28 = sshll.u32 (!%p142_p9), %s162_s27, 5  ;;  %s982_s7 = scalar_lea.sflag (!%p142_p9), [#allocation3], %s162_s27 }
  0x11   : > { %s164_s30 = scalar_lea.vmem (!%p142_p9), [#allocation2], %s576_s28 }
  0x12   : > { %s510_s4 = sshll.u32 (!%p142_p9), %s164_s30, 4  ;;  %s975_s4 = int_to_ptr.vmem [resolvable:$true] %s510_s4 }
  0x13   : > { %v176_v0 = vlaneseq  ;;  %v326_v1 = vld [vmem:[%s1024_s2 + $0x28] sm:$0xff]  ;;  %v325_v2 = vld [vmem:[%s1024_s2 + $0x20] sm:$0xff]  ;;  %v324_v4 = vld [vmem:[%s1024_s2 + $0x18] sm:$0xff]  ;;  %s1049_s24 = smov (!%p166_p10, %s577_s24), 7  ;;  %vm311_vm10 = vcmask 130048   ;;  %vm316_vm11 = vcmask 261120  }
  0x14   : > { %604 = vmatprep.subr.mxu0 %v326_v1  ;;  %622 = vmatprep.subr.mxu1 %v326_v1  ;;  %v323_v7 = vld [vmem:[%s1024_s2 + $0x10] sm:$0xff]  ;;  %s578_s6 = sshll.u32 %s1049_s24, 3  ;;  %v322_v11 = vld [vmem:[%s1024_s2 + $0x8] sm:$0xff]  ;;  %v321_v28 = vld [vmem:[%s1024_s2] sm:$0xff]  ;;  %s756_s24 = smov 32   ;;  %vm327_vm12 = vcmask 392192  }
  0x15   : > { %v835_v3 = vshrl.u32 %v176_v0, 7  ;;  %605 = vmatpush3.msra.mxu0 %v326_v1  ;;  %628 = vmatpush3.msra.mxu1 %v326_v1  ;;  %s169_s9 = scalar_lea.vmem %s1022_s0, %s578_s6  ;;  %v583_v51 = vld [vmem:[%s1023_s1] ss:$0 sm:$0xff]  ;;  %s973_s6 = scalar_lea.hbm %s1025_s3, %s593_s29 }
  0x16   : > { %606 = vmatprep.subr.mxu0 %v325_v2  ;;  %623 = vmatprep.subr.mxu1 %v325_v2  ;;  %v853_v12 = vld [vmem:[%s169_s9 + $0x8] sm:$0xff]  ;;  %v855_v13 = vld [vmem:[%s169_s9] sm:$0xff]  ;;  %v857_v14 = vld [vmem:[%s169_s9 + $0x18] sm:$0xff]  ;;  %s693_s8 = scalar_lea.vmem %s975_s4, 512 }
  0x17   : > { %v179_v5 = vadd.s32 16, %v835_v3  ;;  %v180_v6 = vadd.s32 24, %v835_v3  ;;  %607 = vmatpush3.msra.mxu0 %v325_v2  ;;  %629 = vmatpush3.msra.mxu1 %v325_v2  ;;  %v185_v8 = vand.u32 7, %v835_v3  ;;  %v178_v9 = vadd.s32 8, %v835_v3  ;;  %v862_v16 = vld [vmem:[%s169_s9 + $0x10] sm:$0xff]  ;;  %p694_p11 = scmp.ne.s32.totalorder %s975_s4, %s693_s8  ;;  %s757_s9 = smov [#allocation2]  }
  0x18   : > { %608 = vmatprep.subr.mxu0 %v324_v4  ;;  %624 = vmatprep.subr.mxu1 %v324_v4  ;;  %vm262_vm0 = vcmp.lt.s32.totalorder %v835_v3, 7  ;;  %v261_v17 = vrot.slane %v857_v14, 1  ;;  %v258_v18 = vrot.slane %v855_v13, 1  ;;  %v259_v19 = vrot.slane %v853_v12, 1  ;;  %s697_s10 = sshll.u32 %s757_s9, 4  ;;  %s698_s10 = int_to_ptr.vmem [resolvable:$false] %s697_s10 }
  0x19   : > { %v199_v10 = vand.u32 7, %v179_v5  ;;  %609 = vmatpush3.msra.mxu0 %v324_v4  ;;  %630 = vmatpush3.msra.mxu1 %v324_v4  ;;  %v206_v15 = vand.u32 7, %v180_v6  ;;  %v192_v20 = vand.u32 7, %v178_v9  ;;  %v260_v22 = vrot.slane %v862_v16, 1  ;;  %p695_p12 = pnand %p694_p11, %p818_p5  ;;  %s699_s11 = scalar_lea.vmem %s698_s10, 1024 }
  0x1a   : > { %610 = vmatprep.subr.mxu0 %v323_v7  ;;  %625 = vmatprep.subr.mxu1 %v323_v7  ;;  %vm872_vm2 = vcmp.eq.s32.totalorder %v185_v8, 7  ;;  %vm237_vm3 = vcmp.lt.s32.totalorder %v835_v3, 1  ;;  %v265_v24 = vsel %vm262_vm0, %v258_v18, %v259_v19  ;;  %v233_v26 = vrot.slane %v855_v13, 7  ;;  %p700_p0 = scmp.lt.s32.totalorder %s975_s4, %s698_s10  ;;  %p701_p1 = scmp.lt.s32.totalorder %s699_s11, %s693_s8 }
  0x1b   : > { %285 = vrot.lane.b32.xlu1 %v853_v12, %s755_s17  ;;  %283 = vrot.lane.b32.xlu0 %v855_v13, %s755_s17  ;;  %vm867_vm1 = vcmp.eq.s32.totalorder %v199_v10, 7  ;;  %vm879_vm4 = vcmp.eq.s32.totalorder %v192_v20, 0  ;;  %v234_v27 = vrot.slane %v853_v12, 7  ;;  %v263_v29 = vsel %vm262_vm0, %v260_v22, %v261_v17  ;;  %p696_p13 = pneg %p695_p12 }
  0x1c   : > { %611 = vmatpush3.msra.mxu0 %v323_v7  ;;  %631 = vmatpush3.msra.mxu1 %v323_v7  ;;  %vm890_vm5 = vcmp.eq.s32.totalorder %v206_v15, 7  ;;  %vm894_vm6 = vcmp.eq.s32.totalorder %v185_v8, 0  ;;  %v277_v32 = vsel %vm867_vm1, 0.0, %v263_v29  ;;  %v275_v33 = vsel %vm872_vm2, 0.0, %v265_v24  ;;  %p702_p2 = por %p701_p1, %p700_p0 }
  0x1d   : > { %612 = vmatprep.subr.mxu0 %v322_v11  ;;  %626 = vmatprep.subr.mxu1 %v322_v11  ;;  %v240_v34 = vsel %vm237_vm3, %v233_v26, %v234_v27  ;;  %v236_v35 = vrot.slane %v857_v14, 7  ;;  %vm909_vm7 = vcmp.eq.s32.totalorder %v206_v15, 0  ;;  %v235_v38 = vrot.slane %v862_v16, 7 }
  0x1e   : > { %613 = vmatpush3.msra.mxu0 %v322_v11  ;;  %632 = vmatpush3.msra.mxu1 %v322_v11  ;;  %v251_v36 = vsel %vm879_vm4, 0.0, %v240_v34  ;;  %vm914_vm8 = vcmp.eq.s32.totalorder %v199_v10, 0  ;;  %v266_v40 = vsel %vm262_vm0, %v261_v17, %v258_v18  ;;  %vm920_vm9 = vcmp.eq.s32.totalorder %v192_v20, 7  ;;  %p703_p3 = pnand %p702_p2, %p696_p13 }
  0x1f   : > { %289 = vrot.lane.b32.xlu1 %v857_v14, %s755_s17  ;;  %287 = vrot.lane.b32.xlu0 %v862_v16, %s755_s17  ;;  %v264_v42 = vsel %vm262_vm0, %v259_v19, %v260_v22  ;;  %v241_v43 = vsel %vm237_vm3, %v236_v35, %v233_v26  ;;  %v238_v45 = vsel %vm237_vm3, %v235_v38, %v236_v35  ;;  %v278_v49 = vsel %vm890_vm5, 0.0, %v266_v40 }
  0x20   : > { %614 = vmatprep.subr.mxu0 %v321_v28  ;;  %627 = vmatprep.subr.mxu1 %v321_v28  ;;  %v250_v44 = vsel %vm894_vm6, 0.0, %v241_v43  ;;  %v239_v46 = vsel %vm237_vm3, %v234_v27, %v235_v38  ;;  %v253_v47 = vsel %vm909_vm7, 0.0, %v238_v45  ;;  %v276_v50 = vsel %vm920_vm9, 0.0, %v264_v42 }
  0x21   : > { %615 = vmatpush3.msra.mxu0 %v321_v28  ;;  %633 = vmatpush3.msra.mxu1 %v321_v28  ;;  %v252_v48 = vsel %vm914_vm8, 0.0, %v239_v46  ;;  %v432_v52 = vmul.f32 %v583_v51, %v855_v13  ;;  %v434_v54 = vmul.f32 %v583_v51, %v862_v16  ;;  %v433_v55 = vmul.f32 %v583_v51, %v853_v12 }
  0x22   : > { %v435_v57 = vmul.f32 %v583_v51, %v857_v14 }
  0x23   : > { %303 = vrot.lane.b32.xlu1 %v277_v32, %s756_s24  ;;  %299 = vrot.lane.b32.xlu0 %v275_v33, %s756_s24  ;;  %v436_v53 = vsel %vm311_vm10, %v432_v52, 0.0  ;;  %v442_v56 = vsel %vm311_vm10, %v434_v54, 0.0  ;;  %v439_v58 = vsel %vm311_vm10, %v433_v55, 0.0 }
  0x24   : > { %v445_v59 = vsel %vm311_vm10, %v435_v57, 0.0 }
  0x27   : > { %305 = vrot.lane.b32.xlu1 %v278_v49, %s756_s24  ;;  %301 = vrot.lane.b32.xlu0 %v276_v50, %s756_s24 }
  0x46   : > { %437 = vadd.xlane.f32.xlu0 %v436_v53 }
  0x4a   : > { %443 = vadd.xlane.f32.xlu0 %v442_v56 }
  0x4b   : > { %440 = vadd.xlane.f32.xlu1 %v439_v58 }
  0x4e   : > { %446 = vadd.xlane.f32.xlu0 %v445_v59 }
  0x8d   : > { %v286_v60 = vpop.permute.xlu1 %285  ;;  %v284_v61 = vpop.permute.xlu0 %283 }
  0x8e   : > { %v312_v0 = vsel %vm311_vm10, %v250_v44, %v284_v61  ;;  %v313_v6 = vsel %vm311_vm10, %v251_v36, %v286_v60 }
  0x91   : > { %v290_v62 = vpop.permute.xlu1 %289  ;;  %v288_v63 = vpop.permute.xlu0 %287 }
  0x92   : > { %v314_v1 = vsel %vm311_vm10, %v252_v48, %v288_v63  ;;  %v315_v7 = vsel %vm311_vm10, %v253_v47, %v290_v62 }
  0x95   : > { %v304_v2 = vpop.permute.xlu1 %303  ;;  %v300_v3 = vpop.permute.xlu0 %299 }
  0x96   : > { %v317_v4 = vsel %vm316_vm11, %v312_v0, %v300_v3  ;;  %v319_v5 = vsel %vm316_vm11, %v314_v1, %v304_v2 }
  0x97   : > { %616 = vmatprep.mubr.msk.f32.mxu0 %vm327_vm12, %v317_v4  ;;  %619 = vmatprep.mubr.msk.f32.mxu1 %vm327_vm12, %v319_v5 }
  0x99   : > { %v306_v8 = vpop.permute.xlu1 %305  ;;  %v302_v9 = vpop.permute.xlu0 %301 }
  0x9a   : > { %v320_v10 = vsel %vm316_vm11, %v315_v7, %v306_v8  ;;  %v318_v11 = vsel %vm316_vm11, %v313_v6, %v302_v9 }
  0x9b   : > { %617 = vmatmul.mubr.msk.f32.vlgmr.msra.gmra.mxu0 %vm327_vm12, %v318_v11  ;;  %620 = vmatmul.mubr.msk.f32.vlgmr.msra.gmra.mxu1 %vm327_vm12, %v320_v10 }
  0xcf   : > { %v438_v15 = vpop.xlane.xlu0 %437 }
  0xd0   : > { %v584_v22 = vmul.f32 -1.442695, %v438_v15 }
  0xd3   : > { %v444_v17 = vpop.xlane.xlu0 %443 }
  0xd4   : > { %v441_v18 = vpop.xlane.xlu1 %440  ;;  %v586_v23 = vmul.f32 -1.442695, %v444_v17 }
  0xd5   : > { %v585_v20 = vmul.f32 -1.442695, %v441_v18 }
  0xd7   : > { %v447_v19 = vpop.xlane.xlu0 %446  ;;  %677 = vpow2.f32 %v585_v20 }
  0xd8   : > { %v587_v21 = vmul.f32 -1.442695, %v447_v19 }
  0xda   : > { %679 = vpow2.f32 %v587_v21 }
  0xdb   : > { %681 = vpow2.f32 %v584_v22 }
  0xdc   : > { %683 = vpow2.f32 %v586_v23 }
  0xe4   : > { %v678_v24 = vpop.eup %677 }
  0xe5   : > { %v461_v26 = vadd.f32 1.0, %v678_v24 }
  0xe7   : > { %v680_v25 = vpop.eup %679  ;;  %685 = vrcp.f32 %v461_v26 }
  0xe8   : > { %v463_v27 = vadd.f32 1.0, %v680_v25  ;;  %v682_v28 = vpop.eup %681 }
  0xe9   : > { %v684_v29 = vpop.eup %683  ;;  %v460_v30 = vadd.f32 1.0, %v682_v28 }
  0xea   : > { %687 = vrcp.f32 %v463_v27  ;;  %v462_v31 = vadd.f32 1.0, %v684_v29 }
  0xeb   : > { %689 = vrcp.f32 %v460_v30 }
  0xec   : > { %691 = vrcp.f32 %v462_v31 }
  0xf4   : > { %v686_v32 = vpop.eup %685 }
  0xf7   : > { %v688_v35 = vpop.eup %687 }
  0xf8   : > { %v690_v46 = vpop.eup %689 }
  0xf9   : > { %v692_v48 = vpop.eup %691 }
 0x15b   : > { %v618_v33 = vpop.f32.mrf.mxu0  ;;  %v621_v34 = vpop.f32.mrf.mxu1 }
 0x15c   : > { %vm473_vm13 = vcmp.gt.f32.partialorder %v618_v33, 0.0  ;;  %v477_v36 = vmul.f32 0.01, %v618_v33  ;;  %vm475_vm14 = vcmp.gt.f32.partialorder %v621_v34, 0.0  ;;  %v479_v37 = vmul.f32 0.01, %v621_v34 }
 0x15d   : > { %v406_v38 = vpop.f32.mrf.mxu0  ;;  %v416_v39 = vpop.f32.mrf.mxu1 }
 0x15e   : > { %v481_v40 = vsel %vm473_vm13, %v618_v33, %v477_v36  ;;  %v483_v41 = vsel %vm475_vm14, %v621_v34, %v479_v37  ;;  %vm472_vm15 = vcmp.gt.f32.partialorder %v406_v38, 0.0  ;;  %v476_v42 = vmul.f32 0.01, %v406_v38 }
 0x15f   : > { %v485_v43 = vmul.f32 %v686_v32, %v481_v40  ;;  %v487_v44 = vmul.f32 %v688_v35, %v483_v41  ;;  %vm474_vm0 = vcmp.gt.f32.partialorder %v416_v39, 0.0  ;;  %v478_v45 = vmul.f32 0.01, %v416_v39 }
 0x160   : > { %v480_v47 = vsel %vm472_vm15, %v406_v38, %v476_v42 }
 0x161   : > { %v489_v49 = vadd.f32 %v485_v43, %v853_v12  ;;  %v491_v50 = vadd.f32 %v487_v44, %v857_v14  ;;  %v484_v51 = vmul.f32 %v690_v46, %v480_v47  ;;  %v482_v52 = vsel %vm474_vm0, %v416_v39, %v478_v45 }
 0x162   : > { %v486_v53 = vmul.f32 %v692_v48, %v482_v52 }
 0x163   : > { %493 = vst.msk [vmem:[%s164_s30 + $0x8] sm:$0xff] %vm311_vm10, %v489_v49  ;;  %495 = vst.msk [vmem:[%s164_s30 + $0x18] sm:$0xff] %vm311_vm10, %v491_v50  ;;  %v488_v54 = vadd.f32 %v484_v51, %v855_v13 }
 0x164   : > { %v490_v12 = vadd.f32 %v486_v53, %v862_v16 }
 0x165   : > { %492 = vst.msk [vmem:[%s164_s30] sm:$0xff] %vm311_vm10, %v488_v54 }
 0x166   : > { %494 = vst.msk [vmem:[%s164_s30 + $0x10] sm:$0xff] %vm311_vm10, %v490_v12 }
 0x167   : > { %706 = shalt.err (!%p703_p3)
}
 0x168   : > { %s707_s17 = scalar_lea.hbm %s973_s6, 512  ;;  %s711_s24 = scalar_lea.hbm %s1025_s3, 1024 }
 0x169   : > { %p708_p4 = scmp.ne.s32.totalorder %s973_s6, %s707_s17  ;;  %p712_p9 = scmp.lt.s32.totalorder %s973_s6, %s1025_s3 }
 0x16a   : > { %p713_p10 = scmp.lt.s32.totalorder %s711_s24, %s707_s17 }
 0x16b   : > { %p709_p7 = pnand %p708_p4, %p818_p5 }
 0x16c   : > { %p714_p11 = por %p713_p10, %p712_p9 }
 0x16d   : > { %p710_p8 = pneg %p709_p7 }
 0x16f   : > { %p715_p12 = pnand %p714_p11, %p710_p8 }
 0x171   : > { %718 = shalt.err (!%p715_p12)
}
 0x172   : > { %s758_s27 = smov 128   ;;  %s759_s28 = smov 8  }
 0x173   : > { %634 = dma.vmem_to_hbm [thread:$0]  (%p818_p5), %s975_s4, 512, %s973_s6, %s982_s7, %s758_s27, %s758_s27, %s759_s28  }
 0x174 PF: > { %p640_p13 = scmp.ge.s32.totalorder %s753_s15, 2  ;;  %s525_s29 = sand.u32 1, %s741_s12  }
 0x175   : > { %s526_s30 = scalar_lea.sflag [#allocation3], %s525_s29 }
 0x176   : > { %p637_p0 = pnand %p640_p13, %p822_p6 }
 0x178   : > { %p638_p1 = pneg %p637_p0 }
 0x17a   : > { %736 = dma.done.wait (%p638_p1), %s526_s30, 512  }
 0x17b   : > { %738 = vsyncadd (%p638_p1), %s526_s30, 4294966784  ;;  %p13_p2 = scmp.ge.s32.totalorder %s805_s18, 4   ;;  %s1044_s12 = smov %s745_s13 }
 0x17c   : > { %s1045_s13 = smov %s749_s14  ;;  %s1046_s14 = smov %s816_s21 }
 0x17d   : > { %s1047_s15 = smov %s805_s18  ;;  %15 = sbr.rel (!%p13_p2) target bundleno = 3 (0x3), region = 67 }
 0x182   :  { %531 = vsyncpa [#allocation3], 1 }
 0x183   :  { %533 = vsyncpa [#allocation3 + $0x1], 1 }

</bundles_post_ra>
